<compile_context>
chip_gen: v7x
topology: tpu7x:2x2x1
jax: 0.10.0
libtpu: 0.0.40
codegen_flags: <defaults>
</compile_context>

<pallas_src>
import functools

import jax
import jax.numpy as jnp
from jax.experimental import pallas as pl
from jax.experimental.pallas import tpu as pltpu

FEATURE_DIM = 1024      # dinov2-large hidden_size
BOTTLENECK_DIM = 2048
CLS_HIDDEN = 1024
NUM_CLASSES = 500
PADDED_CLASSES = 512    # lane-dense (multiple of 128); extra cols are zero
BN_EPS = 1e-5
PATCH = 8               # patch size for the backbone stand-in

VMEM_LIMIT_BYTES = 48 * 1024 * 1024    # > default scoped limits, < v7x 64 MiB physical
VMEM_BUDGET_BYTES = 40 * 1024 * 1024   # tile-picker target, headroom under the limit


# ---------------------------------------------------------------------------
# Kernel 1: streaming mean over tokens (accumulated across the seq grid axis
#           directly in the resident fp32 output block).
# ---------------------------------------------------------------------------
def mean_tokens_kernel(tokens_ref, feats_ref, *, inv_seq):
    s = pl.program_id(1)

    @pl.when(s == 0)
    def _init():
        feats_ref[...] = jnp.zeros_like(feats_ref)

    # Partial sum over this seq tile. Tokens are streamed as bf16; widen to f32
    # so the accumulation matches the fp32 torch mean (the f32 temp is included
    # in the VMEM tile budget of _choose_tiles).
    feats_ref[...] += jnp.sum(tokens_ref[...].astype(jnp.float32), axis=1)

    @pl.when(s == pl.num_programs(1) - 1)
    def _finalize():
        feats_ref[...] *= inv_seq          # divide by the TRUE sequence length


# ---------------------------------------------------------------------------
# Kernel 2: fused MLP head on the MXU.
#   bottleneck: Linear(1024,2048) with BN(eval) folded in -> ReLU -> Dropout(id)
#   classifier: Linear(2048,1024) -> ReLU -> Dropout(id) -> Linear(1024,512pad)
# ---------------------------------------------------------------------------
def mlp_head_kernel(feats_ref, w1_ref, b1_ref, w2_ref, b2_ref, w3_ref, b3_ref,
                    out_ref):
    f = feats_ref[...].astype(jnp.bfloat16)
    h = jnp.dot(f, w1_ref[...], preferred_element_type=jnp.float32)
    h = jnp.maximum(h + b1_ref[...], 0.0).astype(jnp.bfloat16)
    h = jnp.dot(h, w2_ref[...], preferred_element_type=jnp.float32)
    h = jnp.maximum(h + b2_ref[...], 0.0).astype(jnp.bfloat16)
    out_ref[...] = (jnp.dot(h, w3_ref[...], preferred_element_type=jnp.float32)
                    + b3_ref[...])


# ---------------------------------------------------------------------------
# Tile selection (VMEM-budget aware, handles arbitrary B and S via padding).
# ---------------------------------------------------------------------------
def _round_up(x, m):
    return ((x + m - 1) // m) * m


def _best_tile(n, cap, step=8):
    """Multiple of `step`, <= cap, minimizing padded size of n; ties -> larger."""
    cap = max(step, (cap // step) * step)
    best, best_key = step, (_round_up(n, step), -step)
    for t in range(step, cap + 1, step):
        key = (_round_up(n, t), -t)
        if key < best_key:
            best, best_key = t, key
    return best


def _choose_tiles(B, S):
    """Jointly pick (TB, TS, B_pad, S_pad) under a per-generation VMEM budget."""
    B8 = _round_up(max(B, 1), 8)
    # Keep >= 2 batch tiles when the batch allows so the "parallel" axis can
    # feed both TensorCores on v7x.
    tb_cap = 128 if B8 < 16 else min(128, max(8, (B8 // 2) // 8 * 8))
    TB = _best_tile(B8, tb_cap)

    # VMEM for the mean kernel per grid step:
    #   2 x bf16 token block (double buffer) + 1 x f32 widened temp + 2 x f32 out
    fixed = 2 * TB * FEATURE_DIM * 4
    per_ts = TB * FEATURE_DIM * (2 * 2 + 4)
    ts_cap = 8
    t = 8
    while t <= 128 and fixed + per_ts * t <= VMEM_BUDGET_BYTES:
        ts_cap = t
        t += 8
    TS = _best_tile(S, ts_cap)
    return TB, TS, _round_up(B8, TB), _round_up(S, TS)


def net_head(tokens, hp):
    """tokens: [B, S, D] backbone output. Returns logits [B, NUM_CLASSES]."""
    B, S, D = tokens.shape
    assert D == FEATURE_DIM
    TB, TS, B_pad, S_pad = _choose_tiles(B, S)

    tok = tokens.astype(jnp.bfloat16)               # stream tokens in bf16
    if (B_pad, S_pad) != (B, S):
        tok = jnp.pad(tok, ((0, B_pad - B), (0, S_pad - S), (0, 0)))

    # ---- kernel 1: streaming mean (HBM-bandwidth bound) ---------------------
    mean_cost = pl.CostEstimate(
        flops=B_pad * S_pad * D, transcendentals=0,
        bytes_accessed=int(tok.size) * 2 + B_pad * D * 4)
    feats = pl.pallas_call(
        functools.partial(mean_tokens_kernel, inv_seq=1.0 / S),
        out_shape=jax.ShapeDtypeStruct((B_pad, D), jnp.float32),
        grid_spec=pltpu.PrefetchScalarGridSpec(
            num_scalar_prefetch=0,
            grid=(B_pad // TB, S_pad // TS),
            in_specs=[pl.BlockSpec((TB, TS, D), lambda b, s: (b, s, 0))],
            out_specs=pl.BlockSpec((TB, D), lambda b, s: (b, 0)),
        ),
        compiler_params=pltpu.CompilerParams(
            dimension_semantics=("parallel", "arbitrary"),
            vmem_limit_bytes=VMEM_LIMIT_BYTES),
        cost_estimate=mean_cost,
    )(tok)

    # ---- kernel 2: fused MLP head (MXU bound, resident bf16 weights) --------
    weight_bytes = sum(int(v.size) * v.dtype.itemsize for v in hp.values())
    mlp_cost = pl.CostEstimate(
        flops=2 * B_pad * (D * BOTTLENECK_DIM + BOTTLENECK_DIM * CLS_HIDDEN
                           + CLS_HIDDEN * PADDED_CLASSES),
        transcendentals=0,
        bytes_accessed=B_pad * D * 4 + weight_bytes + B_pad * PADDED_CLASSES * 4)
    logits = pl.pallas_call(
        mlp_head_kernel,
        out_shape=jax.ShapeDtypeStruct((B_pad, PADDED_CLASSES), jnp.float32),
        grid_spec=pltpu.PrefetchScalarGridSpec(
            num_scalar_prefetch=0,
            grid=(B_pad // TB,),
            in_specs=[
                pl.BlockSpec((TB, D), lambda i: (i, 0)),
                # Weights/biases: constant index_map -> DMA'd once, VMEM resident.
                pl.BlockSpec((D, BOTTLENECK_DIM), lambda i: (0, 0)),
                pl.BlockSpec((1, BOTTLENECK_DIM), lambda i: (0, 0)),
                pl.BlockSpec((BOTTLENECK_DIM, CLS_HIDDEN), lambda i: (0, 0)),
                pl.BlockSpec((1, CLS_HIDDEN), lambda i: (0, 0)),
                pl.BlockSpec((CLS_HIDDEN, PADDED_CLASSES), lambda i: (0, 0)),
                pl.BlockSpec((1, PADDED_CLASSES), lambda i: (0, 0)),
            ],
            out_specs=pl.BlockSpec((TB, PADDED_CLASSES), lambda i: (i, 0)),
        ),
        compiler_params=pltpu.CompilerParams(
            dimension_semantics=("parallel",),
            vmem_limit_bytes=VMEM_LIMIT_BYTES),
        cost_estimate=mlp_cost,
    )(feats, hp["w1"], hp["b1"], hp["w2"], hp["b2"], hp["w3"], hp["b3"])

    return logits[:B, :NUM_CLASSES]


# ---------------------------------------------------------------------------
# Glue (stand-ins for parts with no clean Pallas equivalent) + param prep.
# ---------------------------------------------------------------------------
def backbone_stub(x, patch_w):
    # TODO(synk): the AutoImageProcessor + frozen DINOv2-large ViT backbone have no
    # clean Pallas equivalent; replaced by a deterministic patch-embedding stub that
    # yields last_hidden_state-shaped tokens [B, S, FEATURE_DIM].
    B, C, H, W = x.shape
    p = PATCH
    patches = x.reshape(B, C, H // p, p, W // p, p)
    patches = patches.transpose(0, 2, 4, 1, 3, 5).reshape(
        B, (H // p) * (W // p), C * p * p)
    return patches.astype(jnp.float32) @ patch_w                 # [B, S, D]


def init_params(key):
    ks = jax.random.split(key, 12)
    scale = 0.02
    return {
        "patch_w": scale * jax.random.normal(ks[0], (3 * PATCH * PATCH, FEATURE_DIM),
                                             jnp.float32),
        "w1": scale * jax.random.normal(ks[1], (FEATURE_DIM, BOTTLENECK_DIM), jnp.float32),
        "b1": scale * jax.random.normal(ks[2], (1, BOTTLENECK_DIM), jnp.float32),
        "gamma": 1.0 + scale * jax.random.normal(ks[3], (1, BOTTLENECK_DIM), jnp.float32),
        "beta": scale * jax.random.normal(ks[4], (1, BOTTLENECK_DIM), jnp.float32),
        "rmean": scale * jax.random.normal(ks[5], (1, BOTTLENECK_DIM), jnp.float32),
        "rvar": jax.random.uniform(ks[6], (1, BOTTLENECK_DIM), jnp.float32, 0.5, 1.5),
        "w2": scale * jax.random.normal(ks[7], (BOTTLENECK_DIM, CLS_HIDDEN), jnp.float32),
        "b2": scale * jax.random.normal(ks[8], (1, CLS_HIDDEN), jnp.float32),
        "w3": scale * jax.random.normal(ks[9], (CLS_HIDDEN, NUM_CLASSES), jnp.float32),
        "b3": scale * jax.random.normal(ks[10], (1, NUM_CLASSES), jnp.float32),
    }


def prepare_head_params(raw):
    """Fold eval-mode BatchNorm1d into Linear1, cast weights to bf16, pad classes
    500 -> 512 (zero columns). Pure constant folding; identical math in fp32."""
    s = raw["gamma"] * jax.lax.rsqrt(raw["rvar"] + BN_EPS)               # [1, 2048]
    w1_f = (raw["w1"] * s).astype(jnp.bfloat16)
    b1_f = ((raw["b1"] - raw["rmean"]) * s + raw["beta"]).astype(jnp.float32)
    w3_p = jnp.zeros((CLS_HIDDEN, PADDED_CLASSES), jnp.float32)
    w3_p = w3_p.at[:, :NUM_CLASSES].set(raw["w3"]).astype(jnp.bfloat16)
    b3_p = jnp.zeros((1, PADDED_CLASSES), jnp.float32)
    b3_p = b3_p.at[:, :NUM_CLASSES].set(raw["b3"])
    return {
        "w1": w1_f, "b1": b1_f,
        "w2": raw["w2"].astype(jnp.bfloat16), "b2": raw["b2"].astype(jnp.float32),
        "w3": w3_p, "b3": b3_p,
    }


def net_forward(x, raw_params, head_params):
    tokens = backbone_stub(x, raw_params["patch_w"])   # base_model stand-in (glue)
    return net_head(tokens, head_params)               # Pallas hot path


# ---------------------------------------------------------------------------
# References for correctness checks.
# ---------------------------------------------------------------------------
def reference_head(tokens, hp):
    """Same numerics path as the kernels (bf16 tokens/matmuls, fp32 accumulation)."""
    feats = jnp.mean(tokens.astype(jnp.bfloat16).astype(jnp.float32), axis=1)
    feats = feats.astype(jnp.bfloat16)
    h = jnp.dot(feats, hp["w1"], preferred_element_type=jnp.float32)
    h = jnp.maximum(h + hp["b1"], 0.0).astype(jnp.bfloat16)
    h = jnp.dot(h, hp["w2"], preferred_element_type=jnp.float32)
    h = jnp.maximum(h + hp["b2"], 0.0).astype(jnp.bfloat16)
    out = jnp.dot(h, hp["w3"], preferred_element_type=jnp.float32) + hp["b3"]
    return out[:, :NUM_CLASSES]


def reference_full_precision(tokens, raw):
    """Un-folded fp32 math of the original module (BN eval, Dropout identity)."""
    feats = tokens.mean(axis=1)
    h = feats @ raw["w1"] + raw["b1"]
    h = (h - raw["rmean"]) * jax.lax.rsqrt(raw["rvar"] + BN_EPS) \
        * raw["gamma"] + raw["beta"]
    h = jnp.maximum(h, 0.0)
    h = jnp.maximum(h @ raw["w2"] + raw["b2"], 0.0)
    return h @ raw["w3"] + raw["b3"]


if __name__ == "__main__":
    key = jax.random.PRNGKey(0)
    k_x, k_p = jax.random.split(key)
    # small image batch (stand-in for the PIL images fed to the processor)
    x = jax.random.normal(k_x, (2, 3, 32, 32), jnp.float32)   # NCHW like PyTorch
    raw = init_params(k_p)
    hp = prepare_head_params(raw)

    tokens = backbone_stub(x, raw["patch_w"])                 # [2, 16, 1024]
    logits = net_head(tokens, hp)
    logits = jax.block_until_ready(logits)
    assert logits.shape == (2, NUM_CLASSES)

    # Check against the same bf16/fp32 numerics path.
    ref = reference_head(tokens, hp)
    assert jnp.allclose(logits, ref, atol=2e-3, rtol=2e-3), \
        float(jnp.max(jnp.abs(logits - ref)))

    # Semantic check against the original un-folded fp32 module math.
    ref_fp32 = reference_full_precision(tokens, raw)
    assert float(jnp.max(jnp.abs(logits - ref_fp32))) < 2e-2

    print("KERNEL_OK")
</pallas_src>

<mosaic_0001>
module attributes {stable_mosaic.version = 11 : i64} {
  func.func @mean_tokens_kernel(%arg0: i32, %arg1: i32, %arg2: memref<8x16x1024xbf16, #tpu.memory_space<vmem>>, %arg3: memref<8x1024xf32, #tpu.memory_space<vmem>>) attributes {dimension_semantics = [#tpu.dimension_semantics<parallel>, #tpu.dimension_semantics<arbitrary>], iteration_bounds = array<i64: 1, 1>, scalar_prefetch = 0 : i64, scratch_operands = 0 : i64, tpu.core_type = #tpu.core_type<tc>, window_params = [{transform_indices = @transform_0, window_bounds = array<i64: 8, 16, 1024>}, {transform_indices = @transform_1, window_bounds = array<i64: 8, 1024>}]} {
    %c0_i32 = arith.constant 0 : i32
    %0 = arith.cmpi eq, %arg1, %c0_i32 : i32
    %1 = arith.extui %0 : i1 to i32
    %c0_i32_0 = arith.constant 0 : i32
    %2 = arith.cmpi ne, %1, %c0_i32_0 : i32
    scf.if %2 {
      %cst_9 = arith.constant 0.000000e+00 : f32
      %12 = vector.broadcast %cst_9 : f32 to vector<8x1024xf32>
      %c0_10 = arith.constant 0 : index
      %c0_11 = arith.constant 0 : index
      %13 = vector.load %arg3[%c0_10, %c0_11] : memref<8x1024xf32, #tpu.memory_space<vmem>>, vector<8x1024xf32>
      tpu.vector_store %arg3[%c0_10, %c0_11], %12 {strides = array<i32>} : memref<8x1024xf32, #tpu.memory_space<vmem>>, vector<8x1024xf32>,
    } else {
    }
    %c0 = arith.constant 0 : index
    %c0_1 = arith.constant 0 : index
    %3 = vector.load %arg3[%c0, %c0_1] : memref<8x1024xf32, #tpu.memory_space<vmem>>, vector<8x1024xf32>
    %c0_2 = arith.constant 0 : index
    %c0_3 = arith.constant 0 : index
    %c0_4 = arith.constant 0 : index
    %4 = vector.load %arg2[%c0_2, %c0_3, %c0_4] : memref<8x16x1024xbf16, #tpu.memory_space<vmem>>, vector<8x16x1024xbf16>
    %5 = arith.extf %4 : vector<8x16x1024xbf16> to vector<8x16x1024xf32>
    %cst = arith.constant dense<0.000000e+00> : vector<8x1024xf32>
    %6 = vector.multi_reduction <add>, %5, %cst [1] : vector<8x16x1024xf32> to vector<8x1024xf32>
    %7 = arith.addf %3, %6 : vector<8x1024xf32>
    %c0_5 = arith.constant 0 : index
    %c0_6 = arith.constant 0 : index
    %8 = vector.load %arg3[%c0_5, %c0_6] : memref<8x1024xf32, #tpu.memory_space<vmem>>, vector<8x1024xf32>
    tpu.vector_store %arg3[%c0_5, %c0_6], %7 {strides = array<i32>} : memref<8x1024xf32, #tpu.memory_space<vmem>>, vector<8x1024xf32>,
    %c0_i32_7 = arith.constant 0 : i32
    %9 = arith.cmpi eq, %arg1, %c0_i32_7 : i32
    %10 = arith.extui %9 : i1 to i32
    %c0_i32_8 = arith.constant 0 : i32
    %11 = arith.cmpi ne, %10, %c0_i32_8 : i32
    scf.if %11 {
      %c0_9 = arith.constant 0 : index
      %c0_10 = arith.constant 0 : index
      %12 = vector.load %arg3[%c0_9, %c0_10] : memref<8x1024xf32, #tpu.memory_space<vmem>>, vector<8x1024xf32>
      %cst_11 = arith.constant 6.250000e-02 : f32
      %13 = vector.broadcast %cst_11 : f32 to vector<8x1024xf32>
      %14 = arith.mulf %12, %13 : vector<8x1024xf32>
      %c0_12 = arith.constant 0 : index
      %c0_13 = arith.constant 0 : index
      %15 = vector.load %arg3[%c0_12, %c0_13] : memref<8x1024xf32, #tpu.memory_space<vmem>>, vector<8x1024xf32>
      tpu.vector_store %arg3[%c0_12, %c0_13], %14 {strides = array<i32>} : memref<8x1024xf32, #tpu.memory_space<vmem>>, vector<8x1024xf32>,
    } else {
    }
    return
  }
  func.func @transform_0(%arg0: i32, %arg1: i32) -> (i32, i32, i32) {
    %c0_i32 = arith.constant 0 : i32
    %c0_i32_0 = arith.constant 0 : i32
    return %arg0, %arg1, %c0_i32 : i32, i32, i32
  }
  func.func @transform_1(%arg0: i32, %arg1: i32) -> (i32, i32) {
    %c0_i32 = arith.constant 0 : i32
    %c0_i32_0 = arith.constant 0 : i32
    return %arg0, %c0_i32 : i32, i32
  }
}

</mosaic_0001>

<bundles_post_ra>
// kernel: tpu_custom_call.1
= control target key start
LH: loop header
LB: loop body
LE: loop exit
PB: predicated region body
PF: predicated region fallthrough
CT: control target
= control target key end

     0   :  { %6 = vsyncpa [#allocation3], 0  ;;  %s1298_s0 = inlined_call_operand.hbm [shape: bf16[8,16,1024], index: 0, kind: input, shape index: {}]   ;;  %s1299_s1 = inlined_call_operand.hbm [shape: f32[8,1024], index: 1, kind: output, shape index: {}]  }
   0x1   :  { %7 = vsyncpa [#allocation4], 0  ;;  %s929_s6 = smov [#allocation2]   ;;  %s881_s10 = scalar_lea.hbm %s1298_s0, 8192 }
   0x2   :  { %s13_s7 = sshll.u32 %s929_s6, 4  ;;  %p882_p0 = scmp.ne.s32.totalorder %s1298_s0, %s881_s10  ;;  %s14_s7 = int_to_ptr.vmem [resolvable:$true] %s13_s7 }
   0x3   :  { %p885_p1 = scmp.lt.u32.totalorder %s881_s10, %s1298_s0 }
   0x5   :  { %p887_p2 = pnand %p885_p1, %p882_p0 }
   0x7   :  { %890 = shalt.err (!%p887_p2)
}
   0x8   :  { %s891_s15 = scalar_lea.vmem %s14_s7, 8192  ;;  %p896_p4 = scmp.lt.s32.totalorder %s14_s7, %s14_s7 }
   0x9   :  { %p892_p3 = scmp.ne.s32.totalorder %s14_s7, %s891_s15  ;;  %p897_p5 = scmp.lt.s32.totalorder %s891_s15, %s891_s15 }
   0xb   :  { %p898_p6 = por %p897_p5, %p896_p4 }
   0xd   :  { %p899_p7 = pnand %p898_p6, %p892_p3 }
   0xf   :  { %902 = shalt.err (!%p899_p7)
}
  0x10   :  { %s930_s16 = smov 512   ;;  %s931_s17 = smov 32  }
  0x11   :  { %19 = dma.hbm_to_vmem [thread:$0]  %s1298_s0, 8192, %s14_s7, [#allocation3], %s930_s16, %s930_s16, %s931_s17  }
  0x12   :  { %925 = dma.done.wait [#allocation3], 8192  }
  0x13   :  { %926 = vsyncadd [#allocation3], 4294959104  ;;  %v955_v0 = vld [vmem:[#allocation2] sm:$0xff]  ;;  %vm747_vm0 = vcmask 1041409   ;;  %vm749_vm1 = vcmask 1042434   ;;  %vm751_vm2 = vcmask 1043459  }
  0x14   :  { %v957_v1 = vld [vmem:[#allocation2 + $0x20] sm:$0xff]  ;;  %v107_v6 = vunpack.c.l.bf16 %v955_v0  ;;  %v108_v9 = vunpack.c.h.bf16 %v955_v0  ;;  %vm753_vm3 = vcmask 1044484   ;;  %vm755_vm4 = vcmask 1045509   ;;  %s932_s0 = smov [#allocation5]  }
  0x15   :  { %v959_v2 = vld [vmem:[#allocation2 + $0x40] sm:$0xff]  ;;  %v115_v7 = vunpack.c.l.bf16 %v957_v1  ;;  %v116_v16 = vunpack.c.h.bf16 %v957_v1  ;;  %vm757_vm5 = vcmask 1046534   ;;  %vm759_vm6 = vcmask 1047559   ;;  %s867_s20 = sshll.u32 %s932_s0, 4  ;;  %s868_s20 = int_to_ptr.vmem [resolvable:$true] %s867_s20 }
  0x16   :  { %v961_v3 = vld [vmem:[#allocation2 + $0x60] sm:$0xff]  ;;  %v123_v8 = vunpack.c.l.bf16 %v959_v2  ;;  %s903_s21 = scalar_lea.vmem %s868_s20, 1024  ;;  %p908_p9 = scmp.lt.s32.totalorder %s868_s20, %s868_s20 }
  0x17   :  { %v963_v4 = vld [vmem:[#allocation2 + $0x80] sm:$0xff]  ;;  %v131_v13 = vunpack.c.l.bf16 %v961_v3  ;;  %v235_v23 = vadd.f32 %v115_v7, %v107_v6  ;;  %p904_p8 = scmp.ne.s32.totalorder %s868_s20, %s903_s21  ;;  %p909_p10 = scmp.lt.s32.totalorder %s903_s21, %s903_s21 }
  0x18   :  { %v965_v5 = vld [vmem:[#allocation2 + $0xa0] sm:$0xff]  ;;  %v139_v14 = vunpack.c.l.bf16 %v963_v4 }
  0x19   :  { %v971_v10 = vld [vmem:[#allocation2 + $0xc0] sm:$0xff]  ;;  %v147_v15 = vunpack.c.l.bf16 %v965_v5  ;;  %v291_v30 = vadd.f32 %v131_v13, %v123_v8  ;;  %v236_v35 = vrot.slane %v235_v23, 4  ;;  %p910_p11 = por %p909_p10, %p908_p9 }
  0x1a   :  { %v973_v11 = vld [vmem:[#allocation2 + $0xe0] sm:$0xff]  ;;  %v155_v20 = vunpack.c.l.bf16 %v971_v10 }
  0x1b   :  { %v975_v12 = vld [vmem:[#allocation2 + $0x100] sm:$0xff]  ;;  %v163_v21 = vunpack.c.l.bf16 %v973_v11  ;;  %v292_v37 = vrot.slane %v291_v30, 4  ;;  %v347_v38 = vadd.f32 %v147_v15, %v139_v14  ;;  %v237_v40 = vadd.f32 %v236_v35, %v235_v23  ;;  %p911_p12 = pnand %p910_p11, %p904_p8 }
  0x1c   :  { %v981_v17 = vld [vmem:[#allocation2 + $0x120] sm:$0xff]  ;;  %v171_v22 = vunpack.c.l.bf16 %v975_v12 }
  0x1d   :  { %v983_v18 = vld [vmem:[#allocation2 + $0x140] sm:$0xff]  ;;  %v179_v27 = vunpack.c.l.bf16 %v981_v17  ;;  %v403_v39 = vadd.f32 %v163_v21, %v155_v20  ;;  %v293_v44 = vadd.f32 %v292_v37, %v291_v30  ;;  %v348_v45 = vrot.slane %v347_v38, 4 }
  0x1e   :  { %v985_v19 = vld [vmem:[#allocation2 + $0x160] sm:$0xff]  ;;  %v187_v28 = vunpack.c.l.bf16 %v983_v18  ;;  %v238_v48 = vrot.slane %v237_v40, 2  ;;  %v124_v37 = vunpack.c.h.bf16 %v959_v2  ;;  %v156_v2 = vunpack.c.h.bf16 %v971_v10 }
  0x1f   :  { %v990_v24 = vld [vmem:[#allocation2 + $0x180] sm:$0xff]  ;;  %v195_v29 = vunpack.c.l.bf16 %v985_v19  ;;  %v459_v41 = vadd.f32 %v179_v27, %v171_v22  ;;  %v404_v46 = vrot.slane %v403_v39, 4  ;;  %v294_v52 = vrot.slane %v293_v44, 2 }
  0x20   :  { %v992_v25 = vld [vmem:[#allocation2 + $0x1a0] sm:$0xff]  ;;  %v203_v32 = vunpack.c.l.bf16 %v990_v24  ;;  %v349_v53 = vadd.f32 %v348_v45, %v347_v38  ;;  %v239_v56 = vadd.f32 %v238_v48, %v237_v40  ;;  %v132_v45 = vunpack.c.h.bf16 %v961_v3 }
  0x21   :  { %v994_v26 = vld [vmem:[#allocation2 + $0x1c0] sm:$0xff]  ;;  %v211_v33 = vunpack.c.l.bf16 %v992_v25  ;;  %v515_v42 = vadd.f32 %v195_v29, %v187_v28  ;;  %v460_v49 = vrot.slane %v459_v41, 4  ;;  %v405_v54 = vadd.f32 %v404_v46, %v403_v39 }
  0x22   :  { %v999_v31 = vld [vmem:[#allocation2 + $0x1e0] sm:$0xff]  ;;  %v219_v34 = vunpack.c.l.bf16 %v994_v26  ;;  %v295_v60 = vadd.f32 %v294_v52, %v293_v44  ;;  %v350_v61 = vrot.slane %v349_v53, 2  ;;  %v240_v6 = vrot.slane %v239_v56, 1 }
  0x23   :  { %v227_v36 = vunpack.c.l.bf16 %v999_v31  ;;  %v571_v43 = vadd.f32 %v211_v33, %v203_v32  ;;  %v516_v50 = vrot.slane %v515_v42, 4  ;;  %v461_v57 = vadd.f32 %v460_v49, %v459_v41 }
  0x24   :  { %v406_v62 = vrot.slane %v405_v54, 2  ;;  %v296_v14 = vrot.slane %v295_v60, 1  ;;  %v351_v15 = vadd.f32 %v350_v61, %v349_v53  ;;  %v241_v22 = vadd.f32 %v240_v6, %v239_v56 }
  0x25   :  { %v627_v47 = vadd.f32 %v227_v36, %v219_v34  ;;  %v572_v51 = vrot.slane %v571_v43, 4  ;;  %v517_v58 = vadd.f32 %v516_v50, %v515_v42  ;;  %v462_v7 = vrot.slane %v461_v57, 2 }
  0x26   :  { %v407_v20 = vadd.f32 %v406_v62, %v405_v54  ;;  %v297_v29 = vadd.f32 %v296_v14, %v295_v60  ;;  %v352_v30 = vrot.slane %v351_v15, 1  ;;  %v140_v48 = vunpack.c.h.bf16 %v963_v4 }
  0x27   :  { %v628_v55 = vrot.slane %v627_v47, 4  ;;  %v573_v59 = vadd.f32 %v572_v51, %v571_v43  ;;  %v518_v8 = vrot.slane %v517_v58, 2  ;;  %v463_v23 = vadd.f32 %v462_v7, %v461_v57 }
  0x28   :  { %v408_v32 = vrot.slane %v407_v20, 1  ;;  %v353_v38 = vadd.f32 %v352_v30, %v351_v15  ;;  %v748_v41 = vsel %vm747_vm0, %v297_v29, %v241_v22  ;;  %v148_v49 = vunpack.c.h.bf16 %v965_v5 }
  0x29   :  { %v629_v63 = vadd.f32 %v628_v55, %v627_v47  ;;  %v574_v13 = vrot.slane %v573_v59, 2  ;;  %v519_v27 = vadd.f32 %v518_v8, %v517_v58  ;;  %v464_v34 = vrot.slane %v463_v23, 1 }
  0x2a   :  { %v409_v39 = vadd.f32 %v408_v32, %v407_v20  ;;  %v750_v47 = vsel %vm749_vm1, %v353_v38, %v748_v41  ;;  %v164_v51 = vunpack.c.h.bf16 %v973_v11  ;;  %v172_v52 = vunpack.c.h.bf16 %v975_v12 }
  0x2b   :  { %v630_v21 = vrot.slane %v629_v63, 2  ;;  %v575_v28 = vadd.f32 %v574_v13, %v573_v59  ;;  %v520_v35 = vrot.slane %v519_v27, 1  ;;  %v465_v42 = vadd.f32 %v464_v34, %v463_v23 }
  0x2c   :  { %v752_v50 = vsel %vm751_vm2, %v409_v39, %v750_v47  ;;  %v180_v54 = vunpack.c.h.bf16 %v981_v17  ;;  %v188_v3 = vunpack.c.h.bf16 %v983_v18  ;;  %v196_v55 = vunpack.c.h.bf16 %v985_v19 }
  0x2d   :  { %v631_v33 = vadd.f32 %v630_v21, %v629_v63  ;;  %v576_v36 = vrot.slane %v575_v28, 1  ;;  %v521_v43 = vadd.f32 %v520_v35, %v519_v27  ;;  %v754_v53 = vsel %vm753_vm3, %v465_v42, %v752_v50  ;;  %v1032_v50 = vld [vmem:[#allocation2 + $0x28] sm:$0xff] }
  0x2e   :  { %v204_v5 = vunpack.c.h.bf16 %v990_v24  ;;  %v212_v56 = vunpack.c.h.bf16 %v992_v25  ;;  %v220_v10 = vunpack.c.h.bf16 %v994_v26  ;;  %v228_v12 = vunpack.c.h.bf16 %v999_v31 }
  0x2f   :  { %v632_v40 = vrot.slane %v631_v33, 1  ;;  %v577_v44 = vadd.f32 %v576_v36, %v575_v28  ;;  %v756_v4 = vsel %vm755_vm4, %v521_v43, %v754_v53  ;;  %v242_v17 = vadd.f32 %v116_v16, %v108_v9 }
  0x30   :  { %v298_v18 = vadd.f32 %v132_v45, %v124_v37  ;;  %v354_v57 = vadd.f32 %v148_v49, %v140_v48  ;;  %v410_v58 = vadd.f32 %v164_v51, %v156_v2  ;;  %v466_v59 = vadd.f32 %v180_v54, %v172_v52  ;;  %v1030_v45 = vld [vmem:[#allocation2 + $0x8] sm:$0xff] }
  0x31   :  { %v633_v46 = vadd.f32 %v632_v40, %v631_v33  ;;  %v758_v11 = vsel %vm757_vm5, %v577_v44, %v756_v4  ;;  %v243_v24 = vrot.slane %v242_v17, 4  ;;  %v522_v25 = vadd.f32 %v196_v55, %v188_v3  ;;  %v1034_v2 = vld [vmem:[#allocation2 + $0x48] sm:$0xff] }
  0x32   :  { %v299_v60 = vrot.slane %v298_v18, 4  ;;  %v355_v61 = vrot.slane %v354_v57, 4  ;;  %v411_v26 = vrot.slane %v410_v58, 4  ;;  %v467_v62 = vrot.slane %v466_v59, 4  ;;  %v1036_v3 = vld [vmem:[#allocation2 + $0x68] sm:$0xff] }
  0x33   :  { %v760_v19 = vsel %vm759_vm6, %v633_v46, %v758_v11  ;;  %v578_v63 = vadd.f32 %v212_v56, %v204_v5  ;;  %v244_v31 = vadd.f32 %v243_v24, %v242_v17  ;;  %v523_v0 = vrot.slane %v522_v25, 4  ;;  %v1038_v55 = vld [vmem:[#allocation2 + $0x88] sm:$0xff] }
  0x34   :  { %826 = vst [vmem:[#allocation5] sm:$0xff] %v760_v19  ;;  %v300_v6 = vadd.f32 %v299_v60, %v298_v18  ;;  %v634_v7 = vadd.f32 %v228_v12, %v220_v10  ;;  %v356_v1 = vadd.f32 %v355_v61, %v354_v57  ;;  %v412_v9 = vadd.f32 %v411_v26, %v410_v58  ;;  %v1041_v10 = vld [vmem:[#allocation2 + $0xa8] sm:$0xff] }
  0x35   :  { %v468_v16 = vadd.f32 %v467_v62, %v466_v59  ;;  %v579_v8 = vrot.slane %v578_v63, 4  ;;  %v245_v13 = vrot.slane %v244_v31, 2  ;;  %v524_v15 = vadd.f32 %v523_v0, %v522_v25  ;;  %v1043_v11 = vld [vmem:[#allocation2 + $0xc8] sm:$0xff] }
  0x36   :  { %v301_v14 = vrot.slane %v300_v6, 2  ;;  %v635_v20 = vrot.slane %v634_v7, 4  ;;  %v357_v21 = vrot.slane %v356_v1, 2  ;;  %v413_v22 = vrot.slane %v412_v9, 2  ;;  %v1045_v12 = vld [vmem:[#allocation2 + $0xe8] sm:$0xff] }
  0x37   :  { %v469_v23 = vrot.slane %v468_v16, 2  ;;  %v580_v27 = vadd.f32 %v579_v8, %v578_v63  ;;  %v246_v28 = vadd.f32 %v245_v13, %v244_v31  ;;  %v525_v30 = vrot.slane %v524_v15, 2  ;;  %v1049_v57 = vld [vmem:[#allocation2 + $0x108] sm:$0xff] }
  0x38   :  { %v302_v29 = vadd.f32 %v301_v14, %v300_v6  ;;  %v636_v32 = vadd.f32 %v635_v20, %v634_v7  ;;  %v358_v33 = vadd.f32 %v357_v21, %v356_v1  ;;  %v414_v34 = vadd.f32 %v413_v22, %v412_v9  ;;  %v1051_v58 = vld [vmem:[#allocation2 + $0x128] sm:$0xff] }
  0x39   :  { %v470_v35 = vadd.f32 %v469_v23, %v468_v16  ;;  %v581_v36 = vrot.slane %v580_v27, 2  ;;  %v247_v37 = vrot.slane %v246_v28, 1  ;;  %v526_v39 = vadd.f32 %v525_v30, %v524_v15  ;;  %v1053_v59 = vld [vmem:[#allocation2 + $0x148] sm:$0xff] }
  0x3a   :  { %v303_v38 = vrot.slane %v302_v29, 1  ;;  %v637_v40 = vrot.slane %v636_v32, 2  ;;  %v359_v41 = vrot.slane %v358_v33, 1  ;;  %v415_v42 = vrot.slane %v414_v34, 1  ;;  %v1058_v26 = vld [vmem:[#allocation2 + $0x168] sm:$0xff] }
  0x3b   :  { %v471_v43 = vrot.slane %v470_v35, 1  ;;  %v582_v44 = vadd.f32 %v581_v36, %v580_v27  ;;  %v248_v46 = vadd.f32 %v247_v37, %v246_v28  ;;  %v527_v48 = vrot.slane %v526_v39, 1  ;;  %v1060_v62 = vld [vmem:[#allocation2 + $0x188] sm:$0xff] }
  0x3c   :  { %v304_v47 = vadd.f32 %v303_v38, %v302_v29  ;;  %v638_v49 = vadd.f32 %v637_v40, %v636_v32  ;;  %v360_v51 = vadd.f32 %v359_v41, %v358_v33  ;;  %v416_v52 = vadd.f32 %v415_v42, %v414_v34  ;;  %v1062_v63 = vld [vmem:[#allocation2 + $0x1a8] sm:$0xff] }
  0x3d   :  { %v472_v53 = vadd.f32 %v471_v43, %v470_v35  ;;  %v583_v54 = vrot.slane %v582_v44, 1  ;;  %v528_v4 = vadd.f32 %v527_v48, %v526_v39  ;;  %v109_v17 = vunpack.c.l.bf16 %v1030_v45  ;;  %v1067_v7 = vld [vmem:[#allocation2 + $0x1c8] sm:$0xff] }
  0x3e   :  { %v639_v5 = vrot.slane %v638_v49, 1  ;;  %v761_v56 = vsel %vm747_vm0, %v304_v47, %v248_v46  ;;  %v117_v24 = vunpack.c.l.bf16 %v1032_v50  ;;  %v125_v60 = vunpack.c.l.bf16 %v1034_v2  ;;  %v1069_v1 = vld [vmem:[#allocation2 + $0x1e8] sm:$0xff] }
  0x3f   :  { %v584_v18 = vadd.f32 %v583_v54, %v582_v44  ;;  %v762_v19 = vsel %vm749_vm1, %v360_v51, %v761_v56  ;;  %v133_v31 = vunpack.c.l.bf16 %v1036_v3  ;;  %v141_v6 = vunpack.c.l.bf16 %v1038_v55 }
  0x40   :  { %v640_v25 = vadd.f32 %v639_v5, %v638_v49  ;;  %v763_v61 = vsel %vm751_vm2, %v416_v52, %v762_v19  ;;  %v149_v9 = vunpack.c.l.bf16 %v1041_v10  ;;  %v157_v16 = vunpack.c.l.bf16 %v1043_v11 }
  0x41   :  { %v764_v0 = vsel %vm753_vm3, %v472_v53, %v763_v61  ;;  %v165_v8 = vunpack.c.l.bf16 %v1045_v12  ;;  %v173_v14 = vunpack.c.l.bf16 %v1049_v57  ;;  %v181_v15 = vunpack.c.l.bf16 %v1051_v58 }
  0x42   :  { %v765_v13 = vsel %vm755_vm4, %v528_v4, %v764_v0  ;;  %v189_v20 = vunpack.c.l.bf16 %v1053_v59  ;;  %v197_v22 = vunpack.c.l.bf16 %v1058_v26  ;;  %v205_v23 = vunpack.c.l.bf16 %v1060_v62 }
  0x43   :  { %v766_v21 = vsel %vm757_vm5, %v584_v18, %v765_v13  ;;  %v213_v27 = vunpack.c.l.bf16 %v1062_v63  ;;  %v221_v29 = vunpack.c.l.bf16 %v1067_v7  ;;  %v229_v30 = vunpack.c.l.bf16 %v1069_v1 }
  0x44   :  { %v767_v28 = vsel %vm759_vm6, %v640_v25, %v766_v21  ;;  %v249_v32 = vadd.f32 %v117_v24, %v109_v17  ;;  %v305_v33 = vadd.f32 %v133_v31, %v125_v60  ;;  %v361_v34 = vadd.f32 %v149_v9, %v141_v6 }
  0x45   :  { %v417_v35 = vadd.f32 %v165_v8, %v157_v16  ;;  %v473_v37 = vadd.f32 %v181_v15, %v173_v14  ;;  %v529_v38 = vadd.f32 %v197_v22, %v189_v20  ;;  %v585_v39 = vadd.f32 %v213_v27, %v205_v23  ;;  %827 = vst [vmem:[#allocation5 + $0x8] sm:$0xff] %v767_v28 }
  0x46   :  { %v250_v36 = vrot.slane %v249_v32, 4  ;;  %v306_v40 = vrot.slane %v305_v33, 4  ;;  %v362_v41 = vrot.slane %v361_v34, 4  ;;  %v641_v43 = vadd.f32 %v229_v30, %v221_v29 }
  0x47   :  { %v418_v42 = vrot.slane %v417_v35, 4  ;;  %v474_v46 = vrot.slane %v473_v37, 4  ;;  %v530_v47 = vrot.slane %v529_v38, 4  ;;  %v586_v48 = vrot.slane %v585_v39, 4 }
  0x48   :  { %v251_v44 = vadd.f32 %v250_v36, %v249_v32  ;;  %v307_v49 = vadd.f32 %v306_v40, %v305_v33  ;;  %v363_v51 = vadd.f32 %v362_v41, %v361_v34  ;;  %v642_v53 = vrot.slane %v641_v43, 4 }
  0x49   :  { %v419_v52 = vadd.f32 %v418_v42, %v417_v35  ;;  %v475_v4 = vadd.f32 %v474_v46, %v473_v37  ;;  %v531_v5 = vadd.f32 %v530_v47, %v529_v38  ;;  %v587_v56 = vadd.f32 %v586_v48, %v585_v39 }
  0x4a   :  { %v252_v54 = vrot.slane %v251_v44, 2  ;;  %v308_v17 = vrot.slane %v307_v49, 2  ;;  %v364_v18 = vrot.slane %v363_v51, 2  ;;  %v643_v24 = vadd.f32 %v642_v53, %v641_v43 }
  0x4b   :  { %v420_v19 = vrot.slane %v419_v52, 2  ;;  %v476_v25 = vrot.slane %v475_v4, 2  ;;  %v532_v61 = vrot.slane %v531_v5, 2  ;;  %v588_v31 = vrot.slane %v587_v56, 2 }
  0x4c   :  { %v253_v60 = vadd.f32 %v252_v54, %v251_v44  ;;  %v309_v6 = vadd.f32 %v308_v17, %v307_v49  ;;  %v365_v0 = vadd.f32 %v364_v18, %v363_v51  ;;  %v644_v16 = vrot.slane %v643_v24, 2 }
  0x4d   :  { %v421_v9 = vadd.f32 %v420_v19, %v419_v52  ;;  %v477_v13 = vadd.f32 %v476_v25, %v475_v4  ;;  %v533_v14 = vadd.f32 %v532_v61, %v531_v5  ;;  %v589_v15 = vadd.f32 %v588_v31, %v587_v56 }
  0x4e   :  { %v254_v8 = vrot.slane %v253_v60, 1  ;;  %v310_v20 = vrot.slane %v309_v6, 1  ;;  %v366_v21 = vrot.slane %v365_v0, 1  ;;  %v645_v23 = vadd.f32 %v644_v16, %v643_v24 }
  0x4f   :  { %v422_v22 = vrot.slane %v421_v9, 1  ;;  %v478_v28 = vrot.slane %v477_v13, 1  ;;  %v534_v29 = vrot.slane %v533_v14, 1  ;;  %v590_v30 = vrot.slane %v589_v15, 1 }
  0x50   :  { %v255_v27 = vadd.f32 %v254_v8, %v253_v60  ;;  %v311_v32 = vadd.f32 %v310_v20, %v309_v6  ;;  %v367_v33 = vadd.f32 %v366_v21, %v365_v0  ;;  %v646_v35 = vrot.slane %v645_v23, 1 }
  0x51   :  { %v423_v34 = vadd.f32 %v422_v22, %v421_v9  ;;  %v479_v36 = vadd.f32 %v478_v28, %v477_v13  ;;  %v535_v37 = vadd.f32 %v534_v29, %v533_v14  ;;  %v591_v38 = vadd.f32 %v590_v30, %v589_v15 }
  0x52   :  { %v110_v39 = vunpack.c.h.bf16 %v1030_v45  ;;  %v647_v40 = vadd.f32 %v646_v35, %v645_v23  ;;  %v768_v41 = vsel %vm747_vm0, %v311_v32, %v255_v27  ;;  %v118_v42 = vunpack.c.h.bf16 %v1032_v50 }
  0x53   :  { %v126_v43 = vunpack.c.h.bf16 %v1034_v2  ;;  %v769_v44 = vsel %vm749_vm1, %v367_v33, %v768_v41  ;;  %v134_v46 = vunpack.c.h.bf16 %v1036_v3  ;;  %v142_v47 = vunpack.c.h.bf16 %v1038_v55 }
  0x54   :  { %v150_v48 = vunpack.c.h.bf16 %v1041_v10  ;;  %v770_v49 = vsel %vm751_vm2, %v423_v34, %v769_v44  ;;  %v158_v51 = vunpack.c.h.bf16 %v1043_v11  ;;  %v166_v45 = vunpack.c.h.bf16 %v1045_v12 }
  0x55   :  { %v174_v52 = vunpack.c.h.bf16 %v1049_v57  ;;  %v771_v50 = vsel %vm753_vm3, %v479_v36, %v770_v49  ;;  %v182_v2 = vunpack.c.h.bf16 %v1051_v58  ;;  %v190_v53 = vunpack.c.h.bf16 %v1053_v59  ;;  %v1112_v49 = vld [vmem:[#allocation2 + $0x30] sm:$0xff] }
  0x56   :  { %v198_v3 = vunpack.c.h.bf16 %v1058_v26  ;;  %v772_v55 = vsel %vm755_vm4, %v535_v37, %v771_v50  ;;  %v206_v10 = vunpack.c.h.bf16 %v1060_v62  ;;  %v214_v54 = vunpack.c.h.bf16 %v1062_v63 }
  0x57   :  { %v222_v11 = vunpack.c.h.bf16 %v1067_v7  ;;  %v773_v12 = vsel %vm757_vm5, %v591_v38, %v772_v55  ;;  %v230_v57 = vunpack.c.h.bf16 %v1069_v1  ;;  %v256_v4 = vadd.f32 %v118_v42, %v110_v39 }
  0x58   :  { %v312_v5 = vadd.f32 %v134_v46, %v126_v43  ;;  %v1108_v58 = vsel %vm759_vm6, %v647_v40, %v773_v12  ;;  %v368_v59 = vadd.f32 %v150_v48, %v142_v47  ;;  %v424_v56 = vadd.f32 %v166_v45, %v158_v51  ;;  %v1110_v43 = vld [vmem:[#allocation2 + $0x10] sm:$0xff] }
  0x59   :  { %v480_v26 = vadd.f32 %v182_v2, %v174_v52  ;;  %v257_v17 = vrot.slane %v256_v4, 4  ;;  %v536_v19 = vadd.f32 %v198_v3, %v190_v53  ;;  %v592_v60 = vadd.f32 %v214_v54, %v206_v10  ;;  %v1114_v51 = vld [vmem:[#allocation2 + $0x50] sm:$0xff] }
  0x5a   :  { %v313_v18 = vrot.slane %v312_v5, 4  ;;  %v369_v62 = vrot.slane %v368_v59, 4  ;;  %v425_v24 = vrot.slane %v424_v56, 4  ;;  %v648_v31 = vadd.f32 %v230_v57, %v222_v11  ;;  %v1116_v53 = vld [vmem:[#allocation2 + $0x70] sm:$0xff] }
  0x5b   :  { %v481_v63 = vrot.slane %v480_v26, 4  ;;  %v258_v7 = vadd.f32 %v257_v17, %v256_v4  ;;  %v537_v61 = vrot.slane %v536_v19, 4  ;;  %v593_v9 = vrot.slane %v592_v60, 4  ;;  %v1118_v3 = vld [vmem:[#allocation2 + $0x90] sm:$0xff] }
  0x5c   :  { %v314_v25 = vadd.f32 %v313_v18, %v312_v5  ;;  %v370_v1 = vadd.f32 %v369_v62, %v368_v59  ;;  %v426_v6 = vadd.f32 %v425_v24, %v424_v56  ;;  %v649_v14 = vrot.slane %v648_v31, 4  ;;  %v1121_v11 = vld [vmem:[#allocation2 + $0xb0] sm:$0xff] }
  0x5d   :  { %v482_v0 = vadd.f32 %v481_v63, %v480_v26  ;;  %v259_v16 = vrot.slane %v258_v7, 2  ;;  %v538_v13 = vadd.f32 %v537_v61, %v536_v19  ;;  %v594_v22 = vadd.f32 %v593_v9, %v592_v60  ;;  %v1123_v12 = vld [vmem:[#allocation2 + $0xd0] sm:$0xff] }
  0x5e   :  { %v315_v8 = vrot.slane %v314_v25, 2  ;;  %v371_v15 = vrot.slane %v370_v1, 2  ;;  %v427_v20 = vrot.slane %v426_v6, 2  ;;  %v650_v29 = vadd.f32 %v649_v14, %v648_v31  ;;  %v1125_v57 = vld [vmem:[#allocation2 + $0xf0] sm:$0xff] }
  0x5f   :  { %v483_v21 = vrot.slane %v482_v0, 2  ;;  %v260_v23 = vadd.f32 %v259_v16, %v258_v7  ;;  %v539_v28 = vrot.slane %v538_v13, 2  ;;  %v595_v34 = vrot.slane %v594_v22, 2  ;;  %v1129_v56 = vld [vmem:[#allocation2 + $0x110] sm:$0xff] }
  0x60   :  { %v316_v27 = vadd.f32 %v315_v8, %v314_v25  ;;  %v372_v30 = vadd.f32 %v371_v15, %v370_v1  ;;  %v428_v32 = vadd.f32 %v427_v20, %v426_v6  ;;  %v651_v38 = vrot.slane %v650_v29, 2  ;;  %v1131_v26 = vld [vmem:[#allocation2 + $0x130] sm:$0xff] }
  0x61   :  { %v484_v33 = vadd.f32 %v483_v21, %v482_v0  ;;  %v261_v35 = vrot.slane %v260_v23, 1  ;;  %v540_v37 = vadd.f32 %v539_v28, %v538_v13  ;;  %v596_v42 = vadd.f32 %v595_v34, %v594_v22  ;;  %v1133_v17 = vld [vmem:[#allocation2 + $0x150] sm:$0xff] }
  0x62   :  { %v317_v36 = vrot.slane %v316_v27, 1  ;;  %v373_v39 = vrot.slane %v372_v30, 1  ;;  %v429_v40 = vrot.slane %v428_v32, 1  ;;  %v652_v48 = vadd.f32 %v651_v38, %v650_v29  ;;  %v1138_v63 = vld [vmem:[#allocation2 + $0x170] sm:$0xff] }
  0x63   :  { %v485_v41 = vrot.slane %v484_v33, 1  ;;  %v262_v44 = vadd.f32 %v261_v35, %v260_v23  ;;  %v541_v47 = vrot.slane %v540_v37, 1  ;;  %v597_v2 = vrot.slane %v596_v42, 1  ;;  %v1140_v60 = vld [vmem:[#allocation2 + $0x190] sm:$0xff] }
  0x64   :  { %v318_v46 = vadd.f32 %v317_v36, %v316_v27  ;;  %v374_v45 = vadd.f32 %v373_v39, %v372_v30  ;;  %v430_v52 = vadd.f32 %v429_v40, %v428_v32  ;;  %v653_v10 = vrot.slane %v652_v48, 1  ;;  %v1142_v7 = vld [vmem:[#allocation2 + $0x1b0] sm:$0xff] }
  0x65   :  { %v486_v50 = vadd.f32 %v485_v41, %v484_v33  ;;  %v542_v55 = vadd.f32 %v541_v47, %v540_v37  ;;  %v111_v4 = vunpack.c.l.bf16 %v1110_v43  ;;  %v598_v5 = vadd.f32 %v597_v2, %v596_v42  ;;  %v1147_v1 = vld [vmem:[#allocation2 + $0x1d0] sm:$0xff] }
  0x66   :  { %v775_v54 = vsel %vm747_vm0, %v318_v46, %v262_v44  ;;  %v119_v18 = vunpack.c.l.bf16 %v1112_v49  ;;  %v127_v19 = vunpack.c.l.bf16 %v1114_v51  ;;  %v654_v62 = vadd.f32 %v653_v10, %v652_v48  ;;  %v1149_v6 = vld [vmem:[#allocation2 + $0x1f0] sm:$0xff] }
  0x67   :  { %v776_v59 = vsel %vm749_vm1, %v374_v45, %v775_v54  ;;  %v135_v25 = vunpack.c.l.bf16 %v1116_v53  ;;  %v143_v61 = vunpack.c.l.bf16 %v1118_v3  ;;  %v151_v0 = vunpack.c.l.bf16 %v1121_v11 }
  0x68   :  { %v777_v24 = vsel %vm751_vm2, %v430_v52, %v776_v59  ;;  %v159_v9 = vunpack.c.l.bf16 %v1123_v12  ;;  %v167_v16 = vunpack.c.l.bf16 %v1125_v57  ;;  %v175_v13 = vunpack.c.l.bf16 %v1129_v56 }
  0x69   :  { %v778_v31 = vsel %vm753_vm3, %v486_v50, %v777_v24  ;;  %v183_v14 = vunpack.c.l.bf16 %v1131_v26  ;;  %v191_v15 = vunpack.c.l.bf16 %v1133_v17  ;;  %v199_v21 = vunpack.c.l.bf16 %v1138_v63 }
  0x6a   :  { %v779_v8 = vsel %vm755_vm4, %v542_v55, %v778_v31  ;;  %v207_v22 = vunpack.c.l.bf16 %v1140_v60  ;;  %v215_v23 = vunpack.c.l.bf16 %v1142_v7  ;;  %v223_v28 = vunpack.c.l.bf16 %v1147_v1 }
  0x6b   :  { %v780_v20 = vsel %vm757_vm5, %v598_v5, %v779_v8  ;;  %v231_v29 = vunpack.c.l.bf16 %v1149_v6  ;;  %v263_v30 = vadd.f32 %v119_v18, %v111_v4  ;;  %v319_v32 = vadd.f32 %v135_v25, %v127_v19 }
  0x6c   :  { %v1163_v27 = vsel %vm759_vm6, %v654_v62, %v780_v20  ;;  %v375_v33 = vadd.f32 %v151_v0, %v143_v61  ;;  %v431_v34 = vadd.f32 %v167_v16, %v159_v9  ;;  %v487_v36 = vadd.f32 %v183_v14, %v175_v13 }
  0x6d   :  { %v264_v35 = vrot.slane %v263_v30, 4  ;;  %v543_v37 = vadd.f32 %v199_v21, %v191_v15  ;;  %v599_v38 = vadd.f32 %v215_v23, %v207_v22  ;;  %v320_v39 = vrot.slane %v319_v32, 4 }
  0x6e   :  { %v376_v40 = vrot.slane %v375_v33, 4  ;;  %v432_v41 = vrot.slane %v431_v34, 4  ;;  %v655_v42 = vadd.f32 %v231_v29, %v223_v28  ;;  %v488_v46 = vrot.slane %v487_v36, 4 }
  0x6f   :  { %v265_v44 = vadd.f32 %v264_v35, %v263_v30  ;;  %v544_v47 = vrot.slane %v543_v37, 4  ;;  %v600_v48 = vrot.slane %v599_v38, 4  ;;  %v321_v45 = vadd.f32 %v320_v39, %v319_v32 }
  0x70   :  { %v377_v52 = vadd.f32 %v376_v40, %v375_v33  ;;  %v433_v50 = vadd.f32 %v432_v41, %v431_v34  ;;  %v656_v2 = vrot.slane %v655_v42, 4  ;;  %v489_v10 = vadd.f32 %v488_v46, %v487_v36 }
  0x71   :  { %v266_v55 = vrot.slane %v265_v44, 2  ;;  %v545_v54 = vadd.f32 %v544_v47, %v543_v37  ;;  %v601_v4 = vadd.f32 %v600_v48, %v599_v38  ;;  %v322_v5 = vrot.slane %v321_v45, 2 }
  0x72   :  { %v378_v59 = vrot.slane %v377_v52, 2  ;;  %v434_v18 = vrot.slane %v433_v50, 2  ;;  %v657_v19 = vadd.f32 %v656_v2, %v655_v42  ;;  %v490_v24 = vrot.slane %v489_v10, 2 }
  0x73   :  { %v267_v62 = vadd.f32 %v266_v55, %v265_v44  ;;  %v546_v25 = vrot.slane %v545_v54, 2  ;;  %v602_v61 = vrot.slane %v601_v4, 2  ;;  %v323_v31 = vadd.f32 %v322_v5, %v321_v45 }
  0x74   :  { %v379_v0 = vadd.f32 %v378_v59, %v377_v52  ;;  %v435_v9 = vadd.f32 %v434_v18, %v433_v50  ;;  %v658_v16 = vrot.slane %v657_v19, 2  ;;  %v491_v13 = vadd.f32 %v490_v24, %v489_v10 }
  0x75   :  { %v268_v8 = vrot.slane %v267_v62, 1  ;;  %v547_v14 = vadd.f32 %v546_v25, %v545_v54  ;;  %v603_v15 = vadd.f32 %v602_v61, %v601_v4  ;;  %v324_v20 = vrot.slane %v323_v31, 1 }
  0x76   :  { %v380_v21 = vrot.slane %v379_v0, 1  ;;  %v436_v22 = vrot.slane %v435_v9, 1  ;;  %v659_v23 = vadd.f32 %v658_v16, %v657_v19  ;;  %v492_v29 = vrot.slane %v491_v13, 1 }
  0x77   :  { %v269_v28 = vadd.f32 %v268_v8, %v267_v62  ;;  %v548_v30 = vrot.slane %v547_v14, 1  ;;  %v604_v32 = vrot.slane %v603_v15, 1  ;;  %v325_v33 = vadd.f32 %v324_v20, %v323_v31 }
  0x78   :  { %v381_v34 = vadd.f32 %v380_v21, %v379_v0  ;;  %v437_v35 = vadd.f32 %v436_v22, %v435_v9  ;;  %v660_v36 = vrot.slane %v659_v23, 1  ;;  %v493_v37 = vadd.f32 %v492_v29, %v491_v13 }
  0x79   :  { %v549_v38 = vadd.f32 %v548_v30, %v547_v14  ;;  %v605_v39 = vadd.f32 %v604_v32, %v603_v15  ;;  %v112_v40 = vunpack.c.h.bf16 %v1110_v43  ;;  %v782_v42 = vsel %vm747_vm0, %v325_v33, %v269_v28 }
  0x7a   :  { %v661_v41 = vadd.f32 %v660_v36, %v659_v23  ;;  %v120_v44 = vunpack.c.h.bf16 %v1112_v49  ;;  %v128_v46 = vunpack.c.h.bf16 %v1114_v51  ;;  %v783_v47 = vsel %vm749_vm1, %v381_v34, %v782_v42 }
  0x7b   :  { %v136_v48 = vunpack.c.h.bf16 %v1116_v53  ;;  %v144_v45 = vunpack.c.h.bf16 %v1118_v3  ;;  %v152_v52 = vunpack.c.h.bf16 %v1121_v11  ;;  %v784_v50 = vsel %vm751_vm2, %v437_v35, %v783_v47 }
  0x7c   :  { %v160_v2 = vunpack.c.h.bf16 %v1123_v12  ;;  %v168_v43 = vunpack.c.h.bf16 %v1125_v57  ;;  %v176_v55 = vunpack.c.h.bf16 %v1129_v56  ;;  %v785_v49 = vsel %vm753_vm3, %v493_v37, %v784_v50 }
  0x7d   :  { %v184_v51 = vunpack.c.h.bf16 %v1131_v26  ;;  %v192_v10 = vunpack.c.h.bf16 %v1133_v17  ;;  %v200_v53 = vunpack.c.h.bf16 %v1138_v63  ;;  %v786_v3 = vsel %vm755_vm4, %v549_v38, %v785_v49 }
  0x7e   :  { %v208_v11 = vunpack.c.h.bf16 %v1140_v60  ;;  %v216_v54 = vunpack.c.h.bf16 %v1142_v7  ;;  %v224_v12 = vunpack.c.h.bf16 %v1147_v1  ;;  %v787_v57 = vsel %vm757_vm5, %v605_v39, %v786_v3  ;;  %v1198_v3 = vld [vmem:[#allocation2 + $0x78] sm:$0xff] }
  0x7f   :  { %v232_v56 = vunpack.c.h.bf16 %v1149_v6  ;;  %v270_v4 = vadd.f32 %v120_v44, %v112_v40  ;;  %v326_v5 = vadd.f32 %v136_v48, %v128_v46  ;;  %v1190_v26 = vsel %vm759_vm6, %v661_v41, %v787_v57  ;;  %v1192_v48 = vld [vmem:[#allocation2 + $0x18] sm:$0xff] }
  0x80   :  { %v382_v17 = vadd.f32 %v152_v52, %v144_v45  ;;  %v438_v59 = vadd.f32 %v168_v43, %v160_v2  ;;  %v494_v63 = vadd.f32 %v184_v51, %v176_v55  ;;  %v550_v62 = vadd.f32 %v200_v53, %v192_v10  ;;  %v1194_v43 = vld [vmem:[#allocation2 + $0x38] sm:$0xff] }
  0x81   :  { %v271_v18 = vrot.slane %v270_v4, 4  ;;  %v327_v19 = vrot.slane %v326_v5, 4  ;;  %v606_v25 = vadd.f32 %v216_v54, %v208_v11  ;;  %v662_v0 = vadd.f32 %v232_v56, %v224_v12  ;;  %v1196_v55 = vld [vmem:[#allocation2 + $0x58] sm:$0xff] }
  0x82   :  { %v383_v60 = vrot.slane %v382_v17, 4  ;;  %v439_v24 = vrot.slane %v438_v59, 4  ;;  %v495_v7 = vrot.slane %v494_v63, 4  ;;  %v551_v31 = vrot.slane %v550_v62, 4  ;;  %v1200_v11 = vld [vmem:[#allocation2 + $0x98] sm:$0xff] }
  0x83   :  { %v272_v1 = vadd.f32 %v271_v18, %v270_v4  ;;  %v328_v61 = vadd.f32 %v327_v19, %v326_v5  ;;  %v607_v8 = vrot.slane %v606_v25, 4  ;;  %v663_v20 = vrot.slane %v662_v0, 4  ;;  %v1203_v56 = vld [vmem:[#allocation2 + $0xb8] sm:$0xff] }
  0x84   :  { %v384_v6 = vadd.f32 %v383_v60, %v382_v17  ;;  %v440_v9 = vadd.f32 %v439_v24, %v438_v59  ;;  %v496_v16 = vadd.f32 %v495_v7, %v494_v63  ;;  %v552_v15 = vadd.f32 %v551_v31, %v550_v62  ;;  %v1205_v4 = vld [vmem:[#allocation2 + $0xd8] sm:$0xff] }
  0x85   :  { %v273_v13 = vrot.slane %v272_v1, 2  ;;  %v329_v14 = vrot.slane %v328_v61, 2  ;;  %v608_v28 = vadd.f32 %v607_v8, %v606_v25  ;;  %v664_v33 = vadd.f32 %v663_v20, %v662_v0  ;;  %v1207_v5 = vld [vmem:[#allocation2 + $0xf8] sm:$0xff] }
  0x86   :  { %v385_v21 = vrot.slane %v384_v6, 2  ;;  %v441_v22 = vrot.slane %v440_v9, 2  ;;  %v497_v23 = vrot.slane %v496_v16, 2  ;;  %v553_v32 = vrot.slane %v552_v15, 2  ;;  %v1211_v18 = vld [vmem:[#allocation2 + $0x118] sm:$0xff] }
  0x87   :  { %v274_v29 = vadd.f32 %v273_v13, %v272_v1  ;;  %v330_v30 = vadd.f32 %v329_v14, %v328_v61  ;;  %v609_v37 = vrot.slane %v608_v28, 2  ;;  %v665_v41 = vrot.slane %v664_v33, 2  ;;  %v1213_v19 = vld [vmem:[#allocation2 + $0x138] sm:$0xff] }
  0x88   :  { %v386_v34 = vadd.f32 %v385_v21, %v384_v6  ;;  %v442_v35 = vadd.f32 %v441_v22, %v440_v9  ;;  %v498_v36 = vadd.f32 %v497_v23, %v496_v16  ;;  %v554_v40 = vadd.f32 %v553_v32, %v552_v15  ;;  %v1215_v62 = vld [vmem:[#allocation2 + $0x158] sm:$0xff] }
  0x89   :  { %v275_v38 = vrot.slane %v274_v29, 1  ;;  %v331_v39 = vrot.slane %v330_v30, 1  ;;  %v610_v47 = vadd.f32 %v609_v37, %v608_v28  ;;  %v666_v2 = vadd.f32 %v665_v41, %v664_v33  ;;  %v1220_v1 = vld [vmem:[#allocation2 + $0x178] sm:$0xff] }
  0x8a   :  { %v387_v42 = vrot.slane %v386_v34, 1  ;;  %v443_v44 = vrot.slane %v442_v35, 1  ;;  %v499_v46 = vrot.slane %v498_v36, 1  ;;  %v555_v50 = vrot.slane %v554_v40, 1  ;;  %v1222_v61 = vld [vmem:[#allocation2 + $0x198] sm:$0xff] }
  0x8b   :  { %v276_v45 = vadd.f32 %v275_v38, %v274_v29  ;;  %v332_v52 = vadd.f32 %v331_v39, %v330_v30  ;;  %v611_v53 = vrot.slane %v610_v47, 1  ;;  %v667_v12 = vrot.slane %v666_v2, 1  ;;  %v1224_v31 = vld [vmem:[#allocation2 + $0x1b8] sm:$0xff] }
  0x8c   :  { %v388_v49 = vadd.f32 %v387_v42, %v386_v34  ;;  %v444_v51 = vadd.f32 %v443_v44, %v442_v35  ;;  %v500_v10 = vadd.f32 %v499_v46, %v498_v36  ;;  %v556_v54 = vadd.f32 %v555_v50, %v554_v40  ;;  %v1229_v16 = vld [vmem:[#allocation2 + $0x1d8] sm:$0xff] }
  0x8d   :  { %v789_v57 = vsel %vm747_vm0, %v332_v52, %v276_v45  ;;  %v113_v17 = vunpack.c.l.bf16 %v1192_v48  ;;  %v612_v59 = vadd.f32 %v611_v53, %v610_v47  ;;  %v121_v60 = vunpack.c.l.bf16 %v1194_v43  ;;  %v1231_v8 = vld [vmem:[#allocation2 + $0x1f8] sm:$0xff] }
  0x8e   :  { %v790_v63 = vsel %vm749_vm1, %v388_v49, %v789_v57  ;;  %v129_v24 = vunpack.c.l.bf16 %v1196_v55  ;;  %v668_v7 = vadd.f32 %v667_v12, %v666_v2  ;;  %v137_v0 = vunpack.c.l.bf16 %v1198_v3 }
  0x8f   :  { %v791_v25 = vsel %vm751_vm2, %v444_v51, %v790_v63  ;;  %v145_v6 = vunpack.c.l.bf16 %v1200_v11  ;;  %v153_v13 = vunpack.c.l.bf16 %v1203_v56  ;;  %v161_v14 = vunpack.c.l.bf16 %v1205_v4 }
  0x90   :  { %v792_v9 = vsel %vm753_vm3, %v500_v10, %v791_v25  ;;  %v169_v15 = vunpack.c.l.bf16 %v1207_v5  ;;  %v177_v21 = vunpack.c.l.bf16 %v1211_v18  ;;  %v185_v22 = vunpack.c.l.bf16 %v1213_v19 }
  0x91   :  { %v793_v20 = vsel %vm755_vm4, %v556_v54, %v792_v9  ;;  %v193_v23 = vunpack.c.l.bf16 %v1215_v62  ;;  %v201_v29 = vunpack.c.l.bf16 %v1220_v1  ;;  %v209_v30 = vunpack.c.l.bf16 %v1222_v61 }
  0x92   :  { %v794_v28 = vsel %vm757_vm5, %v612_v59, %v793_v20  ;;  %v217_v32 = vunpack.c.l.bf16 %v1224_v31  ;;  %v225_v34 = vunpack.c.l.bf16 %v1229_v16  ;;  %v233_v35 = vunpack.c.l.bf16 %v1231_v8 }
  0x93   :  { %v1245_v33 = vsel %vm759_vm6, %v668_v7, %v794_v28  ;;  %v277_v36 = vadd.f32 %v121_v60, %v113_v17  ;;  %v333_v37 = vadd.f32 %v137_v0, %v129_v24  ;;  %v389_v38 = vadd.f32 %v153_v13, %v145_v6 }
  0x94   :  { %v445_v39 = vadd.f32 %v169_v15, %v161_v14  ;;  %v501_v41 = vadd.f32 %v185_v22, %v177_v21  ;;  %v557_v42 = vadd.f32 %v201_v29, %v193_v23  ;;  %v613_v44 = vadd.f32 %v217_v32, %v209_v30 }
  0x95   :  { %v278_v40 = vrot.slane %v277_v36, 4  ;;  %v334_v46 = vrot.slane %v333_v37, 4  ;;  %v390_v47 = vrot.slane %v389_v38, 4  ;;  %v669_v52 = vadd.f32 %v233_v35, %v225_v34 }
  0x96   :  { %v446_v45 = vrot.slane %v445_v39, 4  ;;  %v502_v2 = vrot.slane %v501_v41, 4  ;;  %v558_v49 = vrot.slane %v557_v42, 4  ;;  %v614_v51 = vrot.slane %v613_v44, 4 }
  0x97   :  { %v279_v50 = vadd.f32 %v278_v40, %v277_v36  ;;  %v335_v10 = vadd.f32 %v334_v46, %v333_v37  ;;  %v391_v53 = vadd.f32 %v390_v47, %v389_v38  ;;  %v670_v12 = vrot.slane %v669_v52, 4 }
  0x98   :  { %v447_v54 = vadd.f32 %v446_v45, %v445_v39  ;;  %v503_v17 = vadd.f32 %v502_v2, %v501_v41  ;;  %v559_v59 = vadd.f32 %v558_v49, %v557_v42  ;;  %v615_v63 = vadd.f32 %v614_v51, %v613_v44 }
  0x99   :  { %v280_v57 = vrot.slane %v279_v50, 2  ;;  %v336_v60 = vrot.slane %v335_v10, 2  ;;  %v392_v24 = vrot.slane %v391_v53, 2  ;;  %v671_v25 = vadd.f32 %v670_v12, %v669_v52 }
  0x9a   :  { %v448_v7 = vrot.slane %v447_v54, 2  ;;  %v504_v6 = vrot.slane %v503_v17, 2  ;;  %v560_v9 = vrot.slane %v559_v59, 2  ;;  %v616_v13 = vrot.slane %v615_v63, 2 }
  0x9b   :  { %v281_v0 = vadd.f32 %v280_v57, %v279_v50  ;;  %v337_v14 = vadd.f32 %v336_v60, %v335_v10  ;;  %v393_v15 = vadd.f32 %v392_v24, %v391_v53  ;;  %v672_v21 = vrot.slane %v671_v25, 2 }
  0x9c   :  { %v449_v20 = vadd.f32 %v448_v7, %v447_v54  ;;  %v505_v23 = vadd.f32 %v504_v6, %v503_v17  ;;  %v561_v28 = vadd.f32 %v560_v9, %v559_v59  ;;  %v617_v29 = vadd.f32 %v616_v13, %v615_v63 }
  0x9d   :  { %v282_v22 = vrot.slane %v281_v0, 1  ;;  %v338_v30 = vrot.slane %v337_v14, 1  ;;  %v394_v32 = vrot.slane %v393_v15, 1  ;;  %v673_v35 = vadd.f32 %v672_v21, %v671_v25 }
  0x9e   :  { %v450_v34 = vrot.slane %v449_v20, 1  ;;  %v506_v37 = vrot.slane %v505_v23, 1  ;;  %v562_v38 = vrot.slane %v561_v28, 1  ;;  %v618_v39 = vrot.slane %v617_v29, 1 }
  0x9f   :  { %v283_v36 = vadd.f32 %v282_v22, %v281_v0  ;;  %v339_v40 = vadd.f32 %v338_v30, %v337_v14  ;;  %v395_v41 = vadd.f32 %v394_v32, %v393_v15  ;;  %v674_v44 = vrot.slane %v673_v35, 1 }
  0xa0   :  { %v451_v42 = vadd.f32 %v450_v34, %v449_v20  ;;  %v507_v46 = vadd.f32 %v506_v37, %v505_v23  ;;  %v563_v47 = vadd.f32 %v562_v38, %v561_v28  ;;  %v619_v45 = vadd.f32 %v618_v39, %v617_v29 }
  0xa1   :  { %v114_v52 = vunpack.c.h.bf16 %v1192_v48  ;;  %v675_v50 = vadd.f32 %v674_v44, %v673_v35  ;;  %v796_v2 = vsel %vm747_vm0, %v339_v40, %v283_v36  ;;  %v122_v49 = vunpack.c.h.bf16 %v1194_v43 }
  0xa2   :  { %v130_v51 = vunpack.c.h.bf16 %v1196_v55  ;;  %v797_v10 = vsel %vm749_vm1, %v395_v41, %v796_v2  ;;  %v138_v53 = vunpack.c.h.bf16 %v1198_v3  ;;  %v146_v54 = vunpack.c.h.bf16 %v1200_v11 }
  0xa3   :  { %v154_v12 = vunpack.c.h.bf16 %v1203_v56  ;;  %v798_v57 = vsel %vm751_vm2, %v451_v42, %v797_v10  ;;  %v162_v17 = vunpack.c.h.bf16 %v1205_v4  ;;  %v170_v48 = vunpack.c.h.bf16 %v1207_v5 }
  0xa4   :  { %v178_v59 = vunpack.c.h.bf16 %v1211_v18  ;;  %v799_v43 = vsel %vm753_vm3, %v507_v46, %v798_v57  ;;  %v186_v55 = vunpack.c.h.bf16 %v1213_v19  ;;  %v194_v63 = vunpack.c.h.bf16 %v1215_v62 }
  0xa5   :  { %v202_v3 = vunpack.c.h.bf16 %v1220_v1  ;;  %v800_v11 = vsel %vm755_vm4, %v563_v47, %v799_v43  ;;  %v210_v56 = vunpack.c.h.bf16 %v1222_v61  ;;  %v218_v60 = vunpack.c.h.bf16 %v1224_v31  ;;  %v838_v43 = vld [vmem:[#allocation5 + $0x8] sm:$0xff] }
  0xa6   :  { %v226_v4 = vunpack.c.h.bf16 %v1229_v16  ;;  %v801_v5 = vsel %vm757_vm5, %v619_v45, %v800_v11  ;;  %v234_v18 = vunpack.c.h.bf16 %v1231_v8  ;;  %v284_v24 = vadd.f32 %v122_v49, %v114_v52 }
  0xa7   :  { %v340_v7 = vadd.f32 %v138_v53, %v130_v51  ;;  %v1272_v19 = vsel %vm759_vm6, %v675_v50, %v801_v5  ;;  %v396_v62 = vadd.f32 %v154_v12, %v146_v54  ;;  %v452_v25 = vadd.f32 %v170_v48, %v162_v17  ;;  %v837_v12 = vld [vmem:[#allocation5] sm:$0xff] }
  0xa8   :  { %v508_v1 = vadd.f32 %v186_v55, %v178_v59  ;;  %v285_v0 = vrot.slane %v284_v24, 4  ;;  %v564_v9 = vadd.f32 %v202_v3, %v194_v63  ;;  %v620_v14 = vadd.f32 %v218_v60, %v210_v56 }
  0xa9   :  { %v341_v6 = vrot.slane %v340_v7, 4  ;;  %v397_v61 = vrot.slane %v396_v62, 4  ;;  %v453_v13 = vrot.slane %v452_v25, 4  ;;  %v676_v21 = vadd.f32 %v234_v18, %v226_v4 }
  0xaa   :  { %v509_v31 = vrot.slane %v508_v1, 4  ;;  %v286_v16 = vadd.f32 %v285_v0, %v284_v24  ;;  %v565_v20 = vrot.slane %v564_v9, 4  ;;  %v621_v28 = vrot.slane %v620_v14, 4 }
  0xab   :  { %v342_v15 = vadd.f32 %v341_v6, %v340_v7  ;;  %v398_v8 = vadd.f32 %v397_v61, %v396_v62  ;;  %v454_v22 = vadd.f32 %v453_v13, %v452_v25  ;;  %v677_v34 = vrot.slane %v676_v21, 4 }
  0xac   :  { %v510_v23 = vadd.f32 %v509_v31, %v508_v1  ;;  %v287_v29 = vrot.slane %v286_v16, 2  ;;  %v566_v32 = vadd.f32 %v565_v20, %v564_v9  ;;  %v622_v38 = vadd.f32 %v621_v28, %v620_v14 }
  0xad   :  { %v343_v30 = vrot.slane %v342_v15, 2  ;;  %v399_v35 = vrot.slane %v398_v8, 2  ;;  %v455_v36 = vrot.slane %v454_v22, 2  ;;  %v678_v42 = vadd.f32 %v677_v34, %v676_v21 }
  0xae   :  { %v511_v37 = vrot.slane %v510_v23, 2  ;;  %v288_v39 = vadd.f32 %v287_v29, %v286_v16  ;;  %v567_v41 = vrot.slane %v566_v32, 2  ;;  %v623_v45 = vrot.slane %v622_v38, 2 }
  0xaf   :  { %v344_v40 = vadd.f32 %v343_v30, %v342_v15  ;;  %v400_v44 = vadd.f32 %v399_v35, %v398_v8  ;;  %v456_v46 = vadd.f32 %v455_v36, %v454_v22  ;;  %v679_v49 = vrot.slane %v678_v42, 2 }
  0xb0   :  { %v512_v47 = vadd.f32 %v511_v37, %v510_v23  ;;  %v289_v52 = vrot.slane %v288_v39, 1  ;;  %v568_v2 = vadd.f32 %v567_v41, %v566_v32  ;;  %v624_v54 = vadd.f32 %v623_v45, %v622_v38 }
  0xb1   :  { %v345_v50 = vrot.slane %v344_v40, 1  ;;  %v401_v51 = vrot.slane %v400_v44, 1  ;;  %v457_v10 = vrot.slane %v456_v46, 1  ;;  %v680_v59 = vadd.f32 %v679_v49, %v678_v42 }
  0xb2   :  { %v513_v53 = vrot.slane %v512_v47, 1  ;;  %v290_v57 = vadd.f32 %v289_v52, %v288_v39  ;;  %v569_v48 = vrot.slane %v568_v2, 1  ;;  %v625_v11 = vrot.slane %v624_v54, 1 }
  0xb3   :  { %v346_v17 = vadd.f32 %v345_v50, %v344_v40  ;;  %v402_v55 = vadd.f32 %v401_v51, %v400_v44  ;;  %v458_v63 = vadd.f32 %v457_v10, %v456_v46  ;;  %v681_v60 = vrot.slane %v680_v59, 1 }
  0xb4   :  { %v514_v3 = vadd.f32 %v513_v53, %v512_v47  ;;  %v570_v56 = vadd.f32 %v569_v48, %v568_v2  ;;  %v845_v5 = vmul.f32 0.0625, %v837_v12  ;;  %v626_v18 = vadd.f32 %v625_v11, %v624_v54 }
  0xb5   :  { %v803_v4 = vsel %vm747_vm0, %v346_v17, %v290_v57  ;;  %v846_v7 = vmul.f32 0.0625, %v838_v43  ;;  %v847_v62 = vmul.f32 0.0625, %v1108_v58  ;;  %v682_v25 = vadd.f32 %v681_v60, %v680_v59 }
  0xb6   :  { %v804_v24 = vsel %vm749_vm1, %v402_v55, %v803_v4  ;;  %853 = vst [vmem:[#allocation5] sm:$0xff] %v845_v5  ;;  %v848_v0 = vmul.f32 0.0625, %v1163_v27  ;;  %v849_v6 = vmul.f32 0.0625, %v1190_v26  ;;  %v850_v61 = vmul.f32 0.0625, %v1245_v33 }
  0xb7   :  { %v805_v1 = vsel %vm751_vm2, %v458_v63, %v804_v24  ;;  %854 = vst [vmem:[#allocation5 + $0x8] sm:$0xff] %v846_v7  ;;  %855 = vst [vmem:[#allocation5 + $0x10] sm:$0xff] %v847_v62  ;;  %v851_v13 = vmul.f32 0.0625, %v1272_v19 }
  0xb8   :  { %v806_v9 = vsel %vm753_vm3, %v514_v3, %v805_v1  ;;  %856 = vst [vmem:[#allocation5 + $0x18] sm:$0xff] %v848_v0  ;;  %857 = vst [vmem:[#allocation5 + $0x20] sm:$0xff] %v849_v6 }
  0xb9   :  { %v807_v31 = vsel %vm755_vm4, %v570_v56, %v806_v9  ;;  %858 = vst [vmem:[#allocation5 + $0x28] sm:$0xff] %v850_v61  ;;  %859 = vst [vmem:[#allocation5 + $0x30] sm:$0xff] %v851_v13 }
  0xba   :  { %v808_v58 = vsel %vm757_vm5, %v626_v18, %v807_v31 }
  0xbb   :  { %v809_v27 = vsel %vm759_vm6, %v682_v25, %v808_v58 }
  0xbc   :  { %v852_v26 = vmul.f32 0.0625, %v809_v27 }
  0xbe   :  { %860 = vst [vmem:[#allocation5 + $0x38] sm:$0xff] %v852_v26 }
  0xbf   :  { %914 = shalt.err (!%p911_p12)
}
  0xc0   :  { %s915_s24 = scalar_lea.hbm %s1299_s1, 1024 }
  0xc1   :  { %p916_p13 = scmp.ne.s32.totalorder %s1299_s1, %s915_s24  ;;  %p919_p0 = scmp.lt.u32.totalorder %s915_s24, %s1299_s1 }
  0xc3   :  { %p921_p1 = pnand %p919_p0, %p916_p13 }
  0xc5   :  { %924 = shalt.err (!%p921_p1)
}
  0xc6   :  { %870 = dma.vmem_to_hbm [thread:$0]  %s868_s20, 1024, %s1299_s1, [#allocation4]  }
  0xc7   :  { %927 = dma.done.wait [#allocation4], 1024  }
  0xc8   :  { %928 = vsyncadd [#allocation4], 4294966272 }
  0xc9   :  { %874 = vsyncpa [#allocation3], 1 }
  0xca   :  { %875 = vsyncpa [#allocation4], 1 }

</bundles_post_ra>
